<compile_context>
chip_gen: v6e
topology: v6e:2x2x1
jax: 0.10.0
libtpu: 0.0.40
codegen_flags: <defaults>
</compile_context>

<pallas_src>
import functools

import jax
import jax.numpy as jnp
from jax import lax
from jax.experimental import pallas as pl
from jax.experimental.pallas import tpu as pltpu

_LANE = 128


def _cdiv(a, b):
    return -(-a // b)


def _tpu_hw():
    """Returns (vmem_capacity_bytes, num_tensorcores heuristic)."""
    vmem_cap = 64 << 20  # conservative default if the query is unavailable
    try:
        vmem_cap = int(pltpu.get_tpu_info().vmem_capacity_bytes)
    except Exception:
        pass
    # v7x: 64 MiB VMEM per TC, 2 TCs/chip. v5e/v6e: 128 MiB, 1 TC.
    num_cores = 2 if vmem_cap <= (64 << 20) else 1
    return vmem_cap, num_cores


def _l2norm_rows_kernel(x_ref, o_ref, *, epsilon):
    """General path: one sample per row, L2-normalize along the lane axis."""
    x = x_ref[...].astype(jnp.float32)
    ssq = jnp.sum(x * x, axis=1, keepdims=True)          # [bm, 1]
    inv = 1.0 / (jnp.sqrt(ssq) + epsilon)                # exact recip on tiny column
    o_ref[...] = (x * inv).astype(o_ref.dtype)


def _l2norm_folded_kernel(seg_ref, x_ref, o_ref, *, epsilon):
    """Lane-dense path: 128//d original rows packed per 128-lane row.

    `seg_ref` holds a loop-invariant block-diagonal [128,128] segment matrix
    (hoisted to the wrapper; constant index_map keeps it resident). The MXU
    matmul broadcasts each segment's sum-of-squares back to its lanes without
    cross-lane reshapes. Padded/garbage rows never mix into valid rows because
    the matmul acts row-wise from the right.
    """
    x = x_ref[...].astype(jnp.float32)                   # [bm, 128]
    sq = x * x
    ssq = jnp.dot(sq, seg_ref[...],
                  preferred_element_type=jnp.float32,
                  precision=lax.Precision.HIGHEST)       # per-lane segment sum-of-squares
    inv = 1.0 / (jnp.sqrt(ssq) + epsilon)
    o_ref[...] = (x * inv).astype(o_ref.dtype)


def l2norm(x, epsilon=1e-07, *, block_rows=None):
    assert x.ndim == 2, f"Input dimension requires 2, but get {x.ndim}"
    n, d = x.shape
    itemsize = jnp.dtype(x.dtype).itemsize
    sublane = max(8, 32 // max(itemsize, 1))             # 8 f32 / 16 bf16 / 32 int8
    vmem_cap, num_cores = _tpu_hw()

    # Per-generation x-dtype tile budget: keeps 2 in + 2 out buffers + f32
    # temps comfortably inside VMEM with double-buffering alive.
    tile_budget = (8 << 20) if vmem_cap > (64 << 20) else (4 << 20)

    # Lane-dense folding for small D that divides 128: pack 128//d rows per
    # 128-lane slab. Pad N with zero rows if needed so the fold always applies
    # (zero rows give ssq=0 -> finite output, and are sliced off afterwards).
    use_fold = (d < _LANE) and (_LANE % d == 0)
    if use_fold:
        rows_per_slab = _LANE // d
        pad_n = (-n) % rows_per_slab
        x_in = jnp.pad(x, ((0, pad_n), (0, 0))) if pad_n else x
        n_eff, d_eff = (n + pad_n) // rows_per_slab, _LANE
        x_eff = x_in.reshape(n_eff, d_eff)
        # Loop-invariant block-diagonal segment matrix, built once in the wrapper.
        idx = jnp.arange(_LANE, dtype=jnp.int32) // d
        seg = (idx[:, None] == idx[None, :]).astype(jnp.float32)
        kernel = functools.partial(_l2norm_folded_kernel, epsilon=epsilon)
    else:
        n_eff, d_eff = n, d
        x_eff = x
        seg = None
        kernel = functools.partial(_l2norm_rows_kernel, epsilon=epsilon)

    row_bytes = d_eff * itemsize

    if block_rows is None:
        br = max(1, tile_budget // max(row_bytes, 1))
        if use_fold and itemsize < 4:
            # Keep the HIGHEST-precision seg matmul hidden under HBM on v5e.
            br = min(br, 4096)
        # Never emit a single-step grid for medium/large inputs: force enough
        # blocks for software pipelining and (on v7x) both TensorCores.
        min_blocks = max(4, 2 * num_cores)
        if n_eff >= min_blocks * sublane:
            br = min(br, _cdiv(n_eff, min_blocks))
        br = max(sublane, (br // sublane) * sublane)
        block_rows = min(n_eff, br)
    else:
        # Respect the caller, but sublane-round and clamp to the VMEM budget.
        br = max(1, min(int(block_rows), n_eff,
                        max(sublane, tile_budget // max(row_bytes, 1))))
        if br < n_eff:
            br = max(sublane, (br // sublane) * sublane)
        block_rows = min(n_eff, br)

    # On 2-TC chips, nudge a small odd grid count to a multiple of num_cores.
    if num_cores > 1 and block_rows < n_eff:
        count = _cdiv(n_eff, block_rows)
        if 1 < count < 64 and count % num_cores != 0:
            br = block_rows
            for _ in range(16):
                br -= sublane
                if br < sublane:
                    break
                if _cdiv(n_eff, br) % num_cores == 0:
                    block_rows = br
                    break

    grid = (_cdiv(n_eff, block_rows),)

    # VMEM limit: double-buffered in/out tiles + f32 intermediates + slack,
    # capped at ~75% of physical VMEM (headroom for compiler scratch).
    tile_bytes = block_rows * row_bytes
    f32_tile = block_rows * d_eff * 4
    need = 4 * tile_bytes + 3 * f32_tile + (4 << 20)
    vmem_limit = int(min(max(need, 16 << 20), (vmem_cap * 3) // 4))

    x_spec = pl.BlockSpec((block_rows, d_eff), lambda i: (i, 0))
    out_spec = pl.BlockSpec((block_rows, d_eff), lambda i: (i, 0))
    if use_fold:
        # Constant index_map -> seg stays resident in VMEM, DMA'd only once.
        in_specs = [pl.BlockSpec((_LANE, _LANE), lambda i: (0, 0)), x_spec]
        operands = (seg, x_eff)
    else:
        in_specs = [x_spec]
        operands = (x_eff,)

    out = pl.pallas_call(
        kernel,
        out_shape=jax.ShapeDtypeStruct((n_eff, d_eff), x.dtype),
        grid_spec=pltpu.PrefetchScalarGridSpec(
            num_scalar_prefetch=0,
            grid=grid,
            in_specs=in_specs,
            out_specs=out_spec,
        ),
        compiler_params=pltpu.CompilerParams(
            dimension_semantics=("parallel",),
            vmem_limit_bytes=vmem_limit,
        ),
    )(*operands)

    if use_fold:
        out = out.reshape(-1, d)[:n]
    return out


if __name__ == "__main__":
    key = jax.random.PRNGKey(0)
    k1, k2, k3 = jax.random.split(key, 3)

    def ref(x, eps=1e-07):
        return x / (jnp.linalg.norm(x, axis=1, keepdims=True) + eps)

    # Folded lane-dense path (D=32 divides 128), N multiple of 128/D.
    x1 = jax.random.normal(k1, (8, 32), dtype=jnp.float32)
    o1 = jax.block_until_ready(l2norm(x1))
    assert o1.shape == x1.shape and o1.dtype == x1.dtype
    assert jnp.allclose(o1, ref(x1), atol=1e-5, rtol=1e-5)

    # Folded path with wrapper-side zero-row padding (N=9 not multiple of 4).
    x2 = jax.random.normal(k2, (9, 32), dtype=jnp.float32)
    o2 = jax.block_until_ready(l2norm(x2))
    assert o2.shape == x2.shape and o2.dtype == x2.dtype
    assert jnp.allclose(o2, ref(x2), atol=1e-5, rtol=1e-5)

    # General per-row path, auto tiling (forces a multi-step pipelined grid).
    x3 = jax.random.normal(k3, (300, 256), dtype=jnp.float32)
    o3 = jax.block_until_ready(l2norm(x3))
    assert o3.shape == x3.shape and o3.dtype == x3.dtype
    assert jnp.allclose(o3, ref(x3), atol=1e-5, rtol=1e-5)

    # General path with a non-sublane caller block_rows (gets rounded to 96).
    o4 = jax.block_until_ready(l2norm(x3, block_rows=100))
    assert jnp.allclose(o4, ref(x3), atol=1e-5, rtol=1e-5)

    print("KERNEL_OK")
</pallas_src>

<mosaic_0001>
module attributes {stable_mosaic.version = 11 : i64} {
  func.func @_l2norm_folded_kernel(%arg0: i32, %arg1: memref<128x128xf32, #tpu.memory_space<vmem>>, %arg2: memref<2x128xf32, #tpu.memory_space<vmem>>, %arg3: memref<2x128xf32, #tpu.memory_space<vmem>>) attributes {dimension_semantics = [#tpu.dimension_semantics<parallel>], iteration_bounds = array<i64: 1>, scalar_prefetch = 0 : i64, scratch_operands = 0 : i64, tpu.core_type = #tpu.core_type<tc>, window_params = [{pipeline_mode = #tpu.pipeline_mode<synchronous>, transform_indices = @transform_0, window_bounds = array<i64: 128, 128>}, {transform_indices = @transform_1, window_bounds = array<i64: 2, 128>}, {transform_indices = @transform_2, window_bounds = array<i64: 2, 128>}]} {
    %c0 = arith.constant 0 : index
    %c0_0 = arith.constant 0 : index
    %0 = vector.load %arg2[%c0, %c0_0] : memref<2x128xf32, #tpu.memory_space<vmem>>, vector<2x128xf32>
    %1 = arith.mulf %0, %0 : vector<2x128xf32>
    %c0_1 = arith.constant 0 : index
    %c0_2 = arith.constant 0 : index
    %2 = vector.load %arg1[%c0_1, %c0_2] : memref<128x128xf32, #tpu.memory_space<vmem>>, vector<128x128xf32>
    %cst = arith.constant dense<0.000000e+00> : vector<2x128xf32>
    %3 = tpu.matmul %1, %2, %cst {dimension_numbers = #tpu.dot_dimension_numbers<[1], [0], [0], [1], [0, 0, 1, 1], [], []>, precision = #tpu.contract_precision<fp32>} : vector<2x128xf32>, vector<128x128xf32>, vector<2x128xf32> -> vector<2x128xf32>
    %4 = math.sqrt %3 : vector<2x128xf32>
    %cst_3 = arith.constant 1.000000e-07 : f32
    %5 = vector.broadcast %cst_3 : f32 to vector<2x128xf32>
    %6 = arith.addf %4, %5 : vector<2x128xf32>
    %cst_4 = arith.constant 1.000000e+00 : f32
    %7 = vector.broadcast %cst_4 : f32 to vector<2x128xf32>
    %8 = arith.divf %7, %6 : vector<2x128xf32>
    %9 = arith.mulf %0, %8 : vector<2x128xf32>
    %c0_5 = arith.constant 0 : index
    %c0_6 = arith.constant 0 : index
    %10 = vector.load %arg3[%c0_5, %c0_6] : memref<2x128xf32, #tpu.memory_space<vmem>>, vector<2x128xf32>
    tpu.vector_store %arg3[%c0_5, %c0_6], %9 {strides = array<i32>} : memref<2x128xf32, #tpu.memory_space<vmem>>, vector<2x128xf32>,
    return
  }
  func.func @transform_0(%arg0: i32) -> (i32, i32) {
    %c0_i32 = arith.constant 0 : i32
    %c0_i32_0 = arith.constant 0 : i32
    %c0_i32_1 = arith.constant 0 : i32
    return %c0_i32, %c0_i32_0 : i32, i32
  }
  func.func @transform_1(%arg0: i32) -> (i32, i32) {
    %c0_i32 = arith.constant 0 : i32
    %c0_i32_0 = arith.constant 0 : i32
    return %arg0, %c0_i32 : i32, i32
  }
  func.func @transform_2(%arg0: i32) -> (i32, i32) {
    %c0_i32 = arith.constant 0 : i32
    %c0_i32_0 = arith.constant 0 : i32
    return %arg0, %c0_i32 : i32, i32
  }
}

</mosaic_0001>

<bundles_post_ra>
// kernel: tpu_custom_call.1
= control target key start
LH: loop header
LB: loop body
LE: loop exit
PB: predicated region body
PF: predicated region fallthrough
CT: control target
= control target key end

     0   :  { %7 = vsyncpa [#allocation3], 0  ;;  %s1513_s0 = inlined_call_operand.hbm [shape: f32[128,128], index: 0, kind: input, shape index: {}]   ;;  %s1514_s1 = inlined_call_operand.hbm [shape: f32[2,128], index: 1, kind: input, shape index: {}]   ;;  %s1515_s2 = inlined_call_operand.hbm [shape: f32[2,128], index: 2, kind: output, shape index: {}]  }
   0x1   :  { %8 = vsyncpa [#allocation6], 0 }
   0x2   :  { %9 = vsyncpa [#allocation4], 0  ;;  %s1114_s9 = smov [#allocation2]  }
   0x3   :  { %s15_s10 = sshll.u32 %s1114_s9, 4  ;;  %s16_s10 = int_to_ptr.vmem [resolvable:$true] %s15_s10 }
   0x4   :  { %s1056_s11 = scalar_lea.vmem %s16_s10, 2048  ;;  %p1061_p1 = scmp.lt.s32.totalorder %s16_s10, %s16_s10 }
   0x5   :  { %p1057_p0 = scmp.ne.s32.totalorder %s16_s10, %s1056_s11  ;;  %p1062_p2 = scmp.lt.s32.totalorder %s1056_s11, %s1056_s11 }
   0x7   :  { %p1063_p3 = por %p1062_p2, %p1061_p1 }
   0x9   :  { %p1064_p4 = pnand %p1063_p3, %p1057_p0 }
   0xb   :  { %1067 = shalt.err (!%p1064_p4)
}
   0xc   :  { %s1115_s12 = smov 128   ;;  %s1116_s13 = smov 8  }
   0xd   :  { %21 = dma.hbm_to_vmem [thread:$0]  %s1513_s0, 2048, %s16_s10, [#allocation3], %s1115_s12, %s1115_s12, %s1116_s13  }
   0xe   :  { %s1117_s16 = smov [#allocation5]  }
   0xf   :  { %s28_s17 = sshll.u32 %s1117_s16, 4  ;;  %s29_s17 = int_to_ptr.vmem [resolvable:$true] %s28_s17 }
  0x10   :  { %s1076_s18 = scalar_lea.vmem %s29_s17, 32  ;;  %p1081_p6 = scmp.lt.s32.totalorder %s29_s17, %s29_s17 }
  0x11   :  { %p1077_p5 = scmp.ne.s32.totalorder %s29_s17, %s1076_s18  ;;  %p1082_p7 = scmp.lt.s32.totalorder %s1076_s18, %s1076_s18 }
  0x13   :  { %p1083_p8 = por %p1082_p7, %p1081_p6 }
  0x15   :  { %p1084_p9 = pnand %p1083_p8, %p1077_p5 }
  0x17   :  { %1087 = shalt.err (!%p1084_p9)
}
  0x18   :  { %31 = dma.hbm_to_vmem [thread:$0]  %s1514_s1, 32, %s29_s17, [#allocation6]  }
  0x19   :  { %1108 = dma.done.wait [#allocation3], 2048  }
  0x1a   :  { %1109 = vsyncadd [#allocation3], 4294965248 }
  0x1b   :  { %1110 = dma.done.wait [#allocation6], 32  }
  0x1c   :  { %1111 = vsyncadd [#allocation6], 4294967264  ;;  %v1118_v0 = vmov 0.0   ;;  %vm1119_vm0 = vmmov 0   ;;  %v55_v1 = vld [vmem:[#allocation2 + $0x78] sm:$0xff]  ;;  %v54_v2 = vld [vmem:[#allocation2 + $0x70] sm:$0xff] }
  0x1d   :  { %827 = vmatprep.subr.mxu0 %v1118_v0  ;;  %862 = vmatprep.subr.mxu1 %v1118_v0  ;;  %v53_v3 = vld [vmem:[#allocation2 + $0x68] sm:$0xff]  ;;  %v1148_v4 = vand.u32 4294901760, %v55_v1  ;;  %v1150_v5 = vand.u32 4294901760, %v54_v2  ;;  %v52_v7 = vld [vmem:[#allocation2 + $0x60] sm:$0xff]  ;;  %v51_v8 = vld [vmem:[#allocation2 + $0x58] sm:$0xff]  ;;  %s1120_s0 = smov [#allocation7]  }
  0x1e   :  { %859 = vmatprep.mubr.msk.f32.mxu0 %vm1119_vm0, %v1118_v0  ;;  %894 = vmatprep.mubr.msk.f32.mxu1 %vm1119_vm0, %v1118_v0  ;;  %v1152_v6 = vand.u32 4294901760, %v53_v3  ;;  %v50_v9 = vld [vmem:[#allocation2 + $0x50] sm:$0xff]  ;;  %v1154_v10 = vand.u32 4294901760, %v52_v7  ;;  %v1156_v11 = vand.u32 4294901760, %v51_v8  ;;  %v49_v13 = vld [vmem:[#allocation2 + $0x48] sm:$0xff]  ;;  %v48_v14 = vld [vmem:[#allocation2 + $0x40] sm:$0xff] }
  0x1f   :  { %v1158_v12 = vand.u32 4294901760, %v50_v9  ;;  %828 = vmatpush3.msra.mxu0 %v1148_v4  ;;  %v1162_v15 = vsub.f32 %v55_v1, %v1148_v4  ;;  %v1165_v16 = vsub.f32 %v54_v2, %v1150_v5  ;;  %v1167_v17 = vand.u32 4294901760, %v49_v13  ;;  %v47_v19 = vld [vmem:[#allocation2 + $0x38] sm:$0xff]  ;;  %v46_v26 = vld [vmem:[#allocation2 + $0x30] sm:$0xff]  ;;  %v45_v34 = vld [vmem:[#allocation2 + $0x28] sm:$0xff]  ;;  %s715_s1 = sshll.u32 %s1120_s0, 4  ;;  %s716_s1 = int_to_ptr.vmem [resolvable:$true] %s715_s1 }
  0x20   :  { %v1170_v18 = vsub.f32 %v53_v3, %v1152_v6  ;;  %829 = vmatprep.subr.mxu0 %v1118_v0  ;;  %v1174_v20 = vsub.f32 %v52_v7, %v1154_v10  ;;  %v1177_v21 = vsub.f32 %v51_v8, %v1156_v11  ;;  %v1183_v25 = vand.u32 4294901760, %v48_v14  ;;  %v44_v41 = vld [vmem:[#allocation2 + $0x20] sm:$0xff]  ;;  %v43_v50 = vld [vmem:[#allocation2 + $0x18] sm:$0xff]  ;;  %v42_v54 = vld [vmem:[#allocation2 + $0x10] sm:$0xff]  ;;  %s1088_s21 = scalar_lea.vmem %s716_s1, 32  ;;  %p1093_p11 = scmp.lt.s32.totalorder %s716_s1, %s716_s1 }
  0x21   :  { %830 = vmatpush3.msra.mxu0 %v1150_v5  ;;  %v150_v22 = vand.u32 4294901760, %v1162_v15  ;;  %v157_v23 = vand.u32 4294901760, %v1165_v16  ;;  %v1187_v28 = vand.u32 4294901760, %v47_v19  ;;  %v1191_v30 = vsub.f32 %v50_v9, %v1158_v12  ;;  %v1228_v48 = vld [vmem:[#allocation5] sm:$0x3]  ;;  %v41_v61 = vld [vmem:[#allocation2 + $0x8] sm:$0xff]  ;;  %p1089_p10 = scmp.ne.s32.totalorder %s716_s1, %s1088_s21  ;;  %p1094_p12 = scmp.lt.s32.totalorder %s1088_s21, %s1088_s21 }
  0x22   :  { %v164_v24 = vand.u32 4294901760, %v1170_v18  ;;  %831 = vmatprep.subr.mxu0 %v1118_v0  ;;  %v171_v27 = vand.u32 4294901760, %v1174_v20  ;;  %v178_v29 = vand.u32 4294901760, %v1177_v21  ;;  %v1204_v35 = vsub.f32 %v49_v13, %v1167_v17  ;;  %v40_v8 = vld [vmem:[#allocation2] sm:$0xff] }
  0x23   :  { %832 = vmatpush3.msra.mxu0 %v1152_v6  ;;  %v151_v31 = vsub.f32 %v1162_v15, %v150_v22  ;;  %v158_v32 = vsub.f32 %v1165_v16, %v157_v23  ;;  %v1207_v36 = vand.u32 4294901760, %v46_v26  ;;  %v185_v40 = vand.u32 4294901760, %v1191_v30  ;;  %p1095_p13 = por %p1094_p12, %p1093_p11 }
  0x24   :  { %v165_v33 = vsub.f32 %v1170_v18, %v164_v24  ;;  %833 = vmatprep.subr.mxu0 %v1118_v0  ;;  %v172_v39 = vsub.f32 %v1174_v20, %v171_v27  ;;  %v1215_v42 = vand.u32 4294901760, %v45_v34  ;;  %v1218_v43 = vsub.f32 %v48_v14, %v1183_v25 }
  0x25   :  { %834 = vmatpush3.msra.mxu0 %v1154_v10  ;;  %v152_v37 = vand.u32 4294901760, %v151_v31  ;;  %v159_v38 = vand.u32 4294901760, %v158_v32  ;;  %v179_v45 = vsub.f32 %v1177_v21, %v178_v29  ;;  %v192_v46 = vand.u32 4294901760, %v1204_v35  ;;  %p1096_p0 = pnand %p1095_p13, %p1089_p10 }
  0x26   :  { %835 = vmatprep.subr.mxu0 %v1118_v0  ;;  %v166_v44 = vand.u32 4294901760, %v165_v33  ;;  %v1226_v47 = vsub.f32 %v47_v19, %v1187_v28  ;;  %v1232_v49 = vand.u32 4294901760, %v44_v41  ;;  %v173_v51 = vand.u32 4294901760, %v172_v39 }
  0x27   :  { %836 = vmatpush3.msra.mxu0 %v1156_v11  ;;  %863 = vmatpush3.msra.mxu1 %v152_v37  ;;  %v186_v52 = vsub.f32 %v1191_v30, %v185_v40  ;;  %v199_v53 = vand.u32 4294901760, %v1218_v43  ;;  %v1240_v55 = vsub.f32 %v46_v26, %v1207_v36  ;;  %v39_v57 = vmul.f32 %v1228_v48, %v1228_v48 }
  0x28   :  { %837 = vmatprep.subr.mxu0 %v1118_v0  ;;  %864 = vmatprep.subr.mxu1 %v1118_v0  ;;  %v206_v56 = vand.u32 4294901760, %v1226_v47  ;;  %v180_v58 = vand.u32 4294901760, %v179_v45  ;;  %v193_v59 = vsub.f32 %v1204_v35, %v192_v46  ;;  %v1251_v60 = vand.u32 4294901760, %v43_v50 }
  0x29   :  { %838 = vmatpush3.msra.mxu0 %v1158_v12  ;;  %865 = vmatpush3.msra.mxu1 %v159_v38  ;;  %v1254_v62 = vsub.f32 %v45_v34, %v1215_v42  ;;  %v1258_v63 = vand.u32 4294901760, %v42_v54  ;;  %v1260_v1 = vand.u32 4294901760, %v39_v57  ;;  %v187_v2 = vand.u32 4294901760, %v186_v52 }
  0x2a   :  { %839 = vmatprep.subr.mxu0 %v1118_v0  ;;  %866 = vmatprep.subr.mxu1 %v1118_v0  ;;  %v200_v3 = vsub.f32 %v1218_v43, %v199_v53  ;;  %v213_v7 = vand.u32 4294901760, %v1240_v55  ;;  %v1268_v9 = vsub.f32 %v44_v41, %v1232_v49  ;;  %v207_v13 = vsub.f32 %v1226_v47, %v206_v56 }
  0x2b   :  { %840 = vmatpush3.msra.mxu0 %v1167_v17  ;;  %867 = vmatpush3.msra.mxu1 %v166_v44  ;;  %v1275_v14 = vand.u32 4294901760, %v41_v61  ;;  %v194_v19 = vand.u32 4294901760, %v193_v59  ;;  %v220_v26 = vand.u32 4294901760, %v1254_v62  ;;  %v1280_v31 = vsub.f32 %v39_v57, %v1260_v1 }
  0x2c   :  { %841 = vmatprep.subr.mxu0 %v1118_v0  ;;  %868 = vmatprep.subr.mxu1 %v1118_v0  ;;  %v1283_v32 = vsub.f32 %v43_v50, %v1251_v60  ;;  %v1287_v33 = vand.u32 4294901760, %v40_v8  ;;  %v201_v34 = vand.u32 4294901760, %v200_v3  ;;  %v214_v37 = vsub.f32 %v1240_v55, %v213_v7 }
  0x2d   :  { %842 = vmatpush3.msra.mxu0 %v1183_v25  ;;  %869 = vmatpush3.msra.mxu1 %v173_v51  ;;  %v227_v38 = vand.u32 4294901760, %v1268_v9  ;;  %v1295_v39 = vsub.f32 %v42_v54, %v1258_v63  ;;  %v208_v41 = vand.u32 4294901760, %v207_v13  ;;  %v221_v44 = vsub.f32 %v1254_v62, %v220_v26 }
  0x2e   :  { %843 = vmatprep.subr.mxu0 %v1118_v0  ;;  %870 = vmatprep.subr.mxu1 %v1118_v0  ;;  %v139_v45 = vand.u32 4294901760, %v1280_v31  ;;  %v234_v50 = vand.u32 4294901760, %v1283_v32  ;;  %v1306_v51 = vsub.f32 %v41_v61, %v1275_v14  ;;  %v215_v52 = vand.u32 4294901760, %v214_v37 }
  0x2f   :  { %844 = vmatpush3.msra.mxu0 %v1187_v28  ;;  %871 = vmatpush3.msra.mxu1 %v180_v58  ;;  %v228_v54 = vsub.f32 %v1268_v9, %v227_v38  ;;  %v241_v57 = vand.u32 4294901760, %v1295_v39  ;;  %v1316_v58 = vsub.f32 %v40_v8, %v1287_v33  ;;  %v222_v59 = vand.u32 4294901760, %v221_v44 }
  0x30   :  { %845 = vmatprep.subr.mxu0 %v1118_v0  ;;  %872 = vmatprep.subr.mxu1 %v1118_v0  ;;  %v140_v61 = vsub.f32 %v1280_v31, %v139_v45  ;;  %v248_v3 = vand.u32 4294901760, %v1306_v51 }
  0x31   :  { %846 = vmatpush3.msra.mxu0 %v1207_v36  ;;  %873 = vmatpush3.msra.mxu1 %v187_v2  ;;  %v235_v2 = vsub.f32 %v1283_v32, %v234_v50  ;;  %v229_v8 = vand.u32 4294901760, %v228_v54  ;;  %v242_v13 = vsub.f32 %v1295_v39, %v241_v57 }
  0x32   :  { %847 = vmatprep.subr.mxu0 %v1118_v0  ;;  %874 = vmatprep.subr.mxu1 %v1118_v0 }
  0x33   :  { %848 = vmatpush3.msra.mxu0 %v1215_v42  ;;  %875 = vmatpush3.msra.mxu1 %v194_v19  ;;  %v255_v19 = vand.u32 4294901760, %v1316_v58  ;;  %v236_v37 = vand.u32 4294901760, %v235_v2  ;;  %v243_v44 = vand.u32 4294901760, %v242_v13 }
  0x34   :  { %849 = vmatprep.subr.mxu0 %v1118_v0  ;;  %876 = vmatprep.subr.mxu1 %v1118_v0 }
  0x35   :  { %850 = vmatpush3.msra.mxu0 %v1232_v49  ;;  %877 = vmatpush3.msra.mxu1 %v201_v34  ;;  %v141_v34 = vand.u32 4294901760, %v140_v61 }
  0x36   :  { %851 = vmatprep.subr.mxu0 %v1118_v0  ;;  %878 = vmatprep.subr.mxu1 %v1118_v0 }
  0x37   :  { %852 = vmatpush3.msra.mxu0 %v1251_v60  ;;  %879 = vmatpush3.msra.mxu1 %v208_v41  ;;  %v249_v41 = vsub.f32 %v1306_v51, %v248_v3 }
  0x38   :  { %853 = vmatprep.subr.mxu0 %v1118_v0  ;;  %880 = vmatprep.subr.mxu1 %v1118_v0 }
  0x39   :  { %854 = vmatpush3.msra.mxu0 %v1258_v63  ;;  %881 = vmatpush3.msra.mxu1 %v215_v52  ;;  %v256_v52 = vsub.f32 %v1316_v58, %v255_v19  ;;  %v250_v54 = vand.u32 4294901760, %v249_v41 }
  0x3a   :  { %855 = vmatprep.subr.mxu0 %v1118_v0  ;;  %882 = vmatprep.subr.mxu1 %v1118_v0 }
  0x3b   :  { %856 = vmatpush3.msra.mxu0 %v1275_v14  ;;  %883 = vmatpush3.msra.mxu1 %v222_v59  ;;  %v257_v59 = vand.u32 4294901760, %v256_v52 }
  0x3c   :  { %857 = vmatprep.subr.mxu0 %v1118_v0  ;;  %884 = vmatprep.subr.mxu1 %v1118_v0 }
  0x3d   :  { %858 = vmatpush3.msra.mxu0 %v1287_v33  ;;  %885 = vmatpush3.msra.mxu1 %v229_v8 }
  0x3e   :  { %886 = vmatprep.subr.mxu1 %v1118_v0  ;;  %897 = vmatprep.subr.mxu0 %v1118_v0 }
  0x3f   :  { %860 = vmatmul.mubr.f32.vlgmr.msra.gmra.mxu0 %v141_v34  ;;  %887 = vmatpush3.msra.mxu1 %v236_v37 }
  0x40   :  { %898 = vmatpush3.msra.mxu0 %v1162_v15  ;;  %888 = vmatprep.subr.mxu1 %v1118_v0 }
  0x41   :  { %899 = vmatprep.subr.mxu0 %v1118_v0  ;;  %889 = vmatpush3.msra.mxu1 %v243_v44 }
  0x42   :  { %900 = vmatpush3.msra.mxu0 %v1165_v16  ;;  %890 = vmatprep.subr.mxu1 %v1118_v0 }
  0x43   :  { %901 = vmatprep.subr.mxu0 %v1118_v0  ;;  %891 = vmatpush3.msra.mxu1 %v250_v54 }
  0x44   :  { %902 = vmatpush3.msra.mxu0 %v1170_v18  ;;  %892 = vmatprep.subr.mxu1 %v1118_v0 }
  0x45   :  { %903 = vmatprep.subr.mxu0 %v1118_v0  ;;  %893 = vmatpush3.msra.mxu1 %v257_v59 }
  0x46   :  { %904 = vmatpush3.msra.mxu0 %v1174_v20  ;;  %895 = vmatmul.mubr.f32.vlgmr.msra.gmra.mxu1 %v1260_v1 }
  0x47   :  { %905 = vmatprep.subr.mxu0 %v1118_v0  ;;  %932 = vmatprep.subr.mxu1 %v1118_v0 }
  0x48   :  { %906 = vmatpush3.msra.mxu0 %v1177_v21  ;;  %933 = vmatpush3.msra.mxu1 %v1148_v4 }
  0x49   :  { %907 = vmatprep.subr.mxu0 %v1118_v0  ;;  %934 = vmatprep.subr.mxu1 %v1118_v0 }
  0x4a   :  { %908 = vmatpush3.msra.mxu0 %v1191_v30  ;;  %935 = vmatpush3.msra.mxu1 %v1150_v5 }
  0x4b   :  { %909 = vmatprep.subr.mxu0 %v1118_v0  ;;  %936 = vmatprep.subr.mxu1 %v1118_v0 }
  0x4c   :  { %910 = vmatpush3.msra.mxu0 %v1204_v35  ;;  %937 = vmatpush3.msra.mxu1 %v1152_v6 }
  0x4d   :  { %911 = vmatprep.subr.mxu0 %v1118_v0  ;;  %938 = vmatprep.subr.mxu1 %v1118_v0 }
  0x4e   :  { %912 = vmatpush3.msra.mxu0 %v1218_v43  ;;  %939 = vmatpush3.msra.mxu1 %v1154_v10 }
  0x4f   :  { %913 = vmatprep.subr.mxu0 %v1118_v0  ;;  %940 = vmatprep.subr.mxu1 %v1118_v0 }
  0x50   :  { %914 = vmatpush3.msra.mxu0 %v1226_v47  ;;  %941 = vmatpush3.msra.mxu1 %v1156_v11 }
  0x51   :  { %915 = vmatprep.subr.mxu0 %v1118_v0  ;;  %942 = vmatprep.subr.mxu1 %v1118_v0 }
  0x52   :  { %916 = vmatpush3.msra.mxu0 %v1240_v55  ;;  %943 = vmatpush3.msra.mxu1 %v1158_v12 }
  0x53   :  { %917 = vmatprep.subr.mxu0 %v1118_v0  ;;  %944 = vmatprep.subr.mxu1 %v1118_v0 }
  0x54   :  { %918 = vmatpush3.msra.mxu0 %v1254_v62  ;;  %945 = vmatpush3.msra.mxu1 %v1167_v17 }
  0x55   :  { %919 = vmatprep.subr.mxu0 %v1118_v0  ;;  %946 = vmatprep.subr.mxu1 %v1118_v0 }
  0x56   :  { %920 = vmatpush3.msra.mxu0 %v1268_v9  ;;  %947 = vmatpush3.msra.mxu1 %v1183_v25 }
  0x57   :  { %921 = vmatprep.subr.mxu0 %v1118_v0  ;;  %948 = vmatprep.subr.mxu1 %v1118_v0 }
  0x58   :  { %922 = vmatpush3.msra.mxu0 %v1283_v32  ;;  %949 = vmatpush3.msra.mxu1 %v1187_v28 }
  0x59   :  { %923 = vmatprep.subr.mxu0 %v1118_v0  ;;  %950 = vmatprep.subr.mxu1 %v1118_v0 }
  0x5a   :  { %924 = vmatpush3.msra.mxu0 %v1295_v39  ;;  %951 = vmatpush3.msra.mxu1 %v1207_v36 }
  0x5b   :  { %925 = vmatprep.subr.mxu0 %v1118_v0  ;;  %952 = vmatprep.subr.mxu1 %v1118_v0 }
  0x5c   :  { %926 = vmatpush3.msra.mxu0 %v1306_v51  ;;  %953 = vmatpush3.msra.mxu1 %v1215_v42 }
  0x5d   :  { %927 = vmatprep.subr.mxu0 %v1118_v0  ;;  %954 = vmatprep.subr.mxu1 %v1118_v0 }
  0x5e   :  { %928 = vmatpush3.msra.mxu0 %v1316_v58  ;;  %929 = vmatprep.mubr.msk.f32.mxu0 %vm1119_vm0, %v1118_v0 }
  0x5f   :  { %955 = vmatpush3.msra.mxu1 %v1232_v49  ;;  %930 = vmatmul.mubr.f32.vlgmr.msra.gmra.mxu0 %v1280_v31 }
  0x60   :  { %956 = vmatprep.subr.mxu1 %v1118_v0  ;;  %967 = vmatprep.subr.mxu0 %v1118_v0 }
  0x61   :  { %957 = vmatpush3.msra.mxu1 %v1251_v60  ;;  %968 = vmatpush3.msra.mxu0 %v150_v22 }
  0x62   :  { %958 = vmatprep.subr.mxu1 %v1118_v0  ;;  %969 = vmatprep.subr.mxu0 %v1118_v0 }
  0x63   :  { %959 = vmatpush3.msra.mxu1 %v1258_v63  ;;  %970 = vmatpush3.msra.mxu0 %v157_v23 }
  0x64   :  { %960 = vmatprep.subr.mxu1 %v1118_v0  ;;  %971 = vmatprep.subr.mxu0 %v1118_v0 }
  0x65   :  { %961 = vmatpush3.msra.mxu1 %v1275_v14  ;;  %972 = vmatpush3.msra.mxu0 %v164_v24 }
  0x66   :  { %962 = vmatprep.subr.mxu1 %v1118_v0  ;;  %973 = vmatprep.subr.mxu0 %v1118_v0 }
  0x67   :  { %963 = vmatpush3.msra.mxu1 %v1287_v33  ;;  %964 = vmatprep.mubr.msk.f32.mxu1 %vm1119_vm0, %v1118_v0 }
  0x68   :  { %974 = vmatpush3.msra.mxu0 %v171_v27  ;;  %965 = vmatmul.mubr.f32.vlgmr.msra.gmra.mxu1 %v139_v45 }
  0x69   :  { %975 = vmatprep.subr.mxu0 %v1118_v0  ;;  %1002 = vmatprep.subr.mxu1 %v1118_v0 }
  0x6a   :  { %976 = vmatpush3.msra.mxu0 %v178_v29  ;;  %1003 = vmatpush3.msra.mxu1 %v1148_v4 }
  0x6b   :  { %977 = vmatprep.subr.mxu0 %v1118_v0  ;;  %1004 = vmatprep.subr.mxu1 %v1118_v0 }
  0x6c   :  { %978 = vmatpush3.msra.mxu0 %v185_v40  ;;  %1005 = vmatpush3.msra.mxu1 %v1150_v5 }
  0x6d   :  { %979 = vmatprep.subr.mxu0 %v1118_v0  ;;  %1006 = vmatprep.subr.mxu1 %v1118_v0 }
  0x6e   :  { %980 = vmatpush3.msra.mxu0 %v192_v46  ;;  %1007 = vmatpush3.msra.mxu1 %v1152_v6 }
  0x6f   :  { %981 = vmatprep.subr.mxu0 %v1118_v0  ;;  %1008 = vmatprep.subr.mxu1 %v1118_v0 }
  0x70   :  { %982 = vmatpush3.msra.mxu0 %v199_v53  ;;  %1009 = vmatpush3.msra.mxu1 %v1154_v10 }
  0x71   :  { %983 = vmatprep.subr.mxu0 %v1118_v0  ;;  %1010 = vmatprep.subr.mxu1 %v1118_v0 }
  0x72   :  { %984 = vmatpush3.msra.mxu0 %v206_v56  ;;  %1011 = vmatpush3.msra.mxu1 %v1156_v11 }
  0x73   :  { %985 = vmatprep.subr.mxu0 %v1118_v0  ;;  %1012 = vmatprep.subr.mxu1 %v1118_v0 }
  0x74   :  { %986 = vmatpush3.msra.mxu0 %v213_v7  ;;  %1013 = vmatpush3.msra.mxu1 %v1158_v12 }
  0x75   :  { %987 = vmatprep.subr.mxu0 %v1118_v0  ;;  %1014 = vmatprep.subr.mxu1 %v1118_v0 }
  0x76   :  { %988 = vmatpush3.msra.mxu0 %v220_v26  ;;  %1015 = vmatpush3.msra.mxu1 %v1167_v17 }
  0x77   :  { %989 = vmatprep.subr.mxu0 %v1118_v0  ;;  %1016 = vmatprep.subr.mxu1 %v1118_v0 }
  0x78   :  { %990 = vmatpush3.msra.mxu0 %v227_v38  ;;  %1017 = vmatpush3.msra.mxu1 %v1183_v25 }
  0x79   :  { %991 = vmatprep.subr.mxu0 %v1118_v0  ;;  %1018 = vmatprep.subr.mxu1 %v1118_v0 }
  0x7a   :  { %992 = vmatpush3.msra.mxu0 %v234_v50  ;;  %1019 = vmatpush3.msra.mxu1 %v1187_v28 }
  0x7b   :  { %993 = vmatprep.subr.mxu0 %v1118_v0  ;;  %1020 = vmatprep.subr.mxu1 %v1118_v0 }
  0x7c   :  { %994 = vmatpush3.msra.mxu0 %v241_v57  ;;  %1021 = vmatpush3.msra.mxu1 %v1207_v36 }
  0x7d   :  { %995 = vmatprep.subr.mxu0 %v1118_v0  ;;  %1022 = vmatprep.subr.mxu1 %v1118_v0 }
  0x7e   :  { %996 = vmatpush3.msra.mxu0 %v248_v3  ;;  %1023 = vmatpush3.msra.mxu1 %v1215_v42 }
  0x7f   :  { %997 = vmatprep.subr.mxu0 %v1118_v0  ;;  %1024 = vmatprep.subr.mxu1 %v1118_v0 }
  0x80   :  { %998 = vmatpush3.msra.mxu0 %v255_v19  ;;  %999 = vmatprep.mubr.msk.f32.mxu0 %vm1119_vm0, %v1118_v0 }
  0x81   :  { %1025 = vmatpush3.msra.mxu1 %v1232_v49  ;;  %1000 = vmatmul.mubr.f32.vlgmr.msra.gmra.mxu0 %v1260_v1 }
  0x82   :  { %1026 = vmatprep.subr.mxu1 %v1118_v0  ;;  %1034 = vmatprep.mubr.msk.f32.mxu1 %vm1119_vm0, %v1118_v0 }
  0x83   :  { %1027 = vmatpush3.msra.mxu1 %v1251_v60 }
  0x84   :  { %1028 = vmatprep.subr.mxu1 %v1118_v0 }
  0x85   :  { %1029 = vmatpush3.msra.mxu1 %v1258_v63 }
  0x86   :  { %1030 = vmatprep.subr.mxu1 %v1118_v0 }
  0x87   :  { %1031 = vmatpush3.msra.mxu1 %v1275_v14 }
  0x88   :  { %1032 = vmatprep.subr.mxu1 %v1118_v0 }
  0x89   :  { %1033 = vmatpush3.msra.mxu1 %v1287_v33 }
  0x8a   :  { %1035 = vmatmul.mubr.f32.vlgmr.msra.gmra.mxu1 %v1260_v1 }
  0xff   :  { %v143_v4 = vpop.f32.mrf.mxu0 }
 0x101   :  { %v861_v5 = vpop.f32.mrf.mxu0 }
 0x106   :  { %v294_v6 = vpop.f32.mrf.mxu1 }
 0x107   :  { %v295_v18 = vadd.f32 %v294_v6, %v143_v4 }
 0x108   :  { %v896_v10 = vpop.f32.mrf.mxu1 }
 0x11f   :  { %v398_v11 = vpop.f32.mrf.mxu0 }
 0x120   :  { %v399_v21 = vadd.f32 %v398_v11, %v295_v18 }
 0x121   :  { %v931_v12 = vpop.f32.mrf.mxu0 }
 0x128   :  { %v487_v15 = vpop.f32.mrf.mxu1 }
 0x129   :  { %v488_v22 = vadd.f32 %v487_v15, %v399_v21 }
 0x12a   :  { %v966_v16 = vpop.f32.mrf.mxu1 }
 0x141   :  { %v606_v17 = vpop.f32.mrf.mxu0 }
 0x142   :  { %v607_v23 = vadd.f32 %v606_v17, %v488_v22 }
 0x143   :  { %v1001_v20 = vpop.f32.mrf.mxu0 }
 0x14a   :  { %v693_v24 = vpop.f32.mrf.mxu1 }
 0x14b   :  { %v694_v0 = vadd.f32 %v693_v24, %v607_v23 }
 0x14c   :  { %v1036_v25 = vpop.f32.mrf.mxu1 }
 0x14d   :  { %1044 = vrsqrt.f32 %v694_v0  ;;  %vm699_vm1 = vcmp.eq.f32.partialorder %v694_v0, inf  ;;  %v702_v29 = vand.u32 2147483648, %v694_v0  ;;  %vm701_vm2 = vcmp.eq.f32.partialorder %v694_v0, 0.0 }
 0x15a   :  { %v1045_v27 = vpop.eup %1044 }
 0x15b   :  { %v698_v28 = vmul.f32 %v1045_v27, %v694_v0 }
 0x15d   :  { %v700_v30 = vsel %vm699_vm1, %v694_v0, %v698_v28 }
 0x15e   :  { %v703_v35 = vsel %vm701_vm2, %v702_v29, %v700_v30 }
 0x15f   :  { %v704_v36 = vadd.f32 1e-07, %v703_v35 }
 0x161   :  { %1046 = vrcp.f32 %v704_v36 }
 0x16e   :  { %v1047_v40 = vpop.eup %1046 }
 0x16f   :  { %v707_v42 = vmul.f32 %v1047_v40, %v1228_v48 }
 0x171   :  { %708 = vst [vmem:[#allocation7] sm:$0x3] %v707_v42 }
 0x172   :  { %1099 = shalt.err (!%p1096_p0)
}
 0x173   :  { %718 = dma.vmem_to_hbm [thread:$0]  %s716_s1, 32, %s1515_s2, [#allocation4]  }
 0x174   :  { %1112 = dma.done.wait [#allocation4], 32  }
 0x175   :  { %1113 = vsyncadd [#allocation4], 4294967264 }
 0x176   :  { %722 = vsyncpa [#allocation3], 1 }
 0x177   :  { %723 = vsyncpa [#allocation6], 1 }
 0x178   :  { %724 = vsyncpa [#allocation4], 1 }

</bundles_post_ra>
